<compile_context>
chip_gen: v6e
topology: v6e:2x2x1
jax: 0.10.0
libtpu: 0.0.40
codegen_flags: <defaults>
</compile_context>

<pallas_src>
import functools

import jax
import jax.numpy as jnp
from jax.experimental import pallas as pl
from jax.experimental.pallas import tpu as pltpu


def _round_up(x, m):
    return ((x + m - 1) // m) * m


def actor_kernel(x_ref, w1_ref, b1_ref, w2_ref, b2_ref, wh_ref, bh_ref,
                 out_ref, *, out_dim):
    x = x_ref[...]
    # fc1 + relu
    h1 = jnp.dot(x, w1_ref[...], preferred_element_type=jnp.float32) + b1_ref[...]
    h1 = jnp.maximum(h1, 0.0)
    # fc2 + relu
    h2 = jnp.dot(h1, w2_ref[...], preferred_element_type=jnp.float32) + b2_ref[...]
    h2 = jnp.maximum(h2, 0.0)
    # fused heads: one matmul over packed [hidden, 2*out_dim] weight.
    # lanes [0, out_dim)          -> mu
    # lanes [out_dim, 2*out_dim)  -> log_std (clamp to [-5,2], then exp; EUP slot)
    head = jnp.dot(h2, wh_ref[...], preferred_element_type=jnp.float32) + bh_ref[...]
    lane = jax.lax.broadcasted_iota(jnp.int32, head.shape, 1)
    std_val = jnp.exp(jnp.clip(head, -5.0, 2.0))
    out_ref[...] = jnp.where(lane >= out_dim, std_val, head).astype(out_ref.dtype)


def prepare_params(params):
    """One-time packing of the two heads into a single lane-contiguous matmul.
    Call once outside the hot path (result can be jitted/donated like any weight)."""
    (w1, b1, w2, b2, wmu, bmu, wls, bls) = params
    wh = jnp.concatenate([wmu, wls], axis=1)   # [hidden, 2*out_dim]
    bh = jnp.concatenate([bmu, bls], axis=1)   # [1, 2*out_dim]
    return (w1, b1, w2, b2, wh, bh)


def actor_forward(x, packed_params, *, max_block_b=1024):
    """x: [B, input_dim] f32; packed_params from prepare_params. Returns (mu, std)."""
    (w1, b1, w2, b2, wh, bh) = packed_params
    B, in_dim = x.shape
    hidden = w1.shape[1]
    n_head = wh.shape[1]          # 2 * out_dim
    out_dim = n_head // 2

    # Batch tiling:
    #  * tiles up to max_block_b rows (amortizes ~0.35 us per grid step),
    #  * capped at ~ceil(B/2) (sublane-aligned) so the grid has >=2 steps once
    #    B > 8, letting the "parallel" axis shard across both v7x TensorCores.
    b8 = _round_up(B, 8)
    tb = max(8, min(max_block_b, _round_up((b8 + 1) // 2, 8)))
    b_pad = _round_up(B, tb)
    if b_pad != B:
        x = jnp.pad(x, ((0, b_pad - B), (0, 0)))
    grid = (b_pad // tb,)

    resident = lambda shape: pl.BlockSpec(shape, lambda i: (0, 0))

    flops = 2 * b_pad * (in_dim * hidden + hidden * hidden + hidden * n_head)
    bytes_accessed = 4 * (b_pad * in_dim + b_pad * n_head            # x + out
                          + in_dim * hidden + hidden * hidden        # w1, w2
                          + hidden * n_head + 2 * hidden + n_head)   # wh, b1, b2, bh

    out = pl.pallas_call(
        functools.partial(actor_kernel, out_dim=out_dim),
        out_shape=jax.ShapeDtypeStruct((b_pad, n_head), jnp.float32),
        grid=grid,
        in_specs=[
            pl.BlockSpec((tb, in_dim), lambda i: (i, 0)),   # x: tiled over batch
            resident((in_dim, hidden)),                     # w1 (VMEM-resident)
            resident((1, hidden)),                          # b1
            resident((hidden, hidden)),                     # w2
            resident((1, hidden)),                          # b2
            resident((hidden, n_head)),                     # packed head weight
            resident((1, n_head)),                          # packed head bias
        ],
        # block last dim == full array dim (2*out_dim), so the (8,128) rule is
        # satisfied; narrow masked stores are far cheaper than a padded slab DMA.
        out_specs=pl.BlockSpec((tb, n_head), lambda i: (i, 0)),
        compiler_params=pltpu.CompilerParams(
            dimension_semantics=("parallel",)),             # megacore on v7x
        cost_estimate=pl.CostEstimate(
            flops=flops,
            transcendentals=b_pad * n_head,
            bytes_accessed=bytes_accessed),
    )(x, w1, b1, w2, b2, wh, bh)

    mu = out[:B, :out_dim]
    std = out[:B, out_dim:]
    return mu, std


# jitted entry point (keeps wrapper pad/slice fused around the custom call)
actor_forward_jit = jax.jit(actor_forward, static_argnames=("max_block_b",))


def init_params(key, input_dim, output_dim, hidden_dim=64):
    """Deterministic init mimicking nn.Linear's U(-1/sqrt(fan_in), 1/sqrt(fan_in)).
    Weights stored as [in_features, out_features] (transpose of PyTorch)."""
    def linear(key, fan_in, fan_out):
        kw, kb = jax.random.split(key)
        bound = 1.0 / jnp.sqrt(jnp.float32(fan_in))
        w = jax.random.uniform(kw, (fan_in, fan_out), jnp.float32, -bound, bound)
        b = jax.random.uniform(kb, (1, fan_out), jnp.float32, -bound, bound)
        return w, b
    k1, k2, k3, k4 = jax.random.split(key, 4)
    w1, b1 = linear(k1, input_dim, hidden_dim)
    w2, b2 = linear(k2, hidden_dim, hidden_dim)
    wmu, bmu = linear(k3, hidden_dim, output_dim)
    wls, bls = linear(k4, hidden_dim, output_dim)
    return (w1, b1, w2, b2, wmu, bmu, wls, bls)


def _reference(x, params):
    (w1, b1, w2, b2, wmu, bmu, wls, bls) = params
    h1 = jnp.maximum(x @ w1 + b1, 0.0)
    h2 = jnp.maximum(h1 @ w2 + b2, 0.0)
    mu = h2 @ wmu + bmu
    std = jnp.exp(jnp.clip(h2 @ wls + bls, -5.0, 2.0))
    return mu, std


if __name__ == "__main__":
    key = jax.random.PRNGKey(0)
    kx, kx2, kp = jax.random.split(key, 3)

    input_dim, output_dim, hidden_dim = 8, 4, 64
    params = init_params(kp, input_dim, output_dim, hidden_dim)
    packed = prepare_params(params)   # one-time head packing (hot path stays clean)

    # Small batch (single grid step).
    batch = 8
    x = jax.random.normal(kx, (batch, input_dim), jnp.float32)
    mu, std = actor_forward_jit(x, packed)
    mu = jax.block_until_ready(mu)
    std = jax.block_until_ready(std)
    mu_ref, std_ref = _reference(x, params)
    assert mu.shape == (batch, output_dim) and std.shape == (batch, output_dim)
    assert jnp.allclose(mu, mu_ref, atol=1e-5), "mu mismatch (small batch)"
    assert jnp.allclose(std, std_ref, atol=1e-5), "std mismatch (small batch)"

    # Larger, non-multiple-of-8 batch: exercises batch padding and the >=2-step
    # parallel grid used for v7x megacore sharding.
    batch2 = 300
    x2 = jax.random.normal(kx2, (batch2, input_dim), jnp.float32)
    mu2, std2 = actor_forward_jit(x2, packed)
    mu2 = jax.block_until_ready(mu2)
    std2 = jax.block_until_ready(std2)
    mu2_ref, std2_ref = _reference(x2, params)
    assert mu2.shape == (batch2, output_dim) and std2.shape == (batch2, output_dim)
    assert jnp.allclose(mu2, mu2_ref, atol=1e-5), "mu mismatch (large batch)"
    assert jnp.allclose(std2, std2_ref, atol=1e-5), "std mismatch (large batch)"

    print("KERNEL_OK")
</pallas_src>

<mosaic_0001>
module attributes {stable_mosaic.version = 11 : i64} {
  func.func @actor_kernel(%arg0: i32, %arg1: memref<8x8xf32, #tpu.memory_space<vmem>>, %arg2: memref<8x64xf32, #tpu.memory_space<vmem>>, %arg3: memref<1x64xf32, #tpu.memory_space<vmem>>, %arg4: memref<64x64xf32, #tpu.memory_space<vmem>>, %arg5: memref<1x64xf32, #tpu.memory_space<vmem>>, %arg6: memref<64x8xf32, #tpu.memory_space<vmem>>, %arg7: memref<1x8xf32, #tpu.memory_space<vmem>>, %arg8: memref<8x8xf32, #tpu.memory_space<vmem>>) attributes {dimension_semantics = [#tpu.dimension_semantics<parallel>], iteration_bounds = array<i64: 1>, scalar_prefetch = 0 : i64, scratch_operands = 0 : i64, tpu.core_type = #tpu.core_type<tc>, window_params = [{transform_indices = @transform_0, window_bounds = array<i64: 8, 8>}, {pipeline_mode = #tpu.pipeline_mode<synchronous>, transform_indices = @transform_1, window_bounds = array<i64: 8, 64>}, {pipeline_mode = #tpu.pipeline_mode<synchronous>, transform_indices = @transform_2, window_bounds = array<i64: 1, 64>}, {pipeline_mode = #tpu.pipeline_mode<synchronous>, transform_indices = @transform_3, window_bounds = array<i64: 64, 64>}, {pipeline_mode = #tpu.pipeline_mode<synchronous>, transform_indices = @transform_4, window_bounds = array<i64: 1, 64>}, {pipeline_mode = #tpu.pipeline_mode<synchronous>, transform_indices = @transform_5, window_bounds = array<i64: 64, 8>}, {pipeline_mode = #tpu.pipeline_mode<synchronous>, transform_indices = @transform_6, window_bounds = array<i64: 1, 8>}, {transform_indices = @transform_7, window_bounds = array<i64: 8, 8>}]} {
    %c0 = arith.constant 0 : index
    %c0_0 = arith.constant 0 : index
    %0 = vector.load %arg1[%c0, %c0_0] : memref<8x8xf32, #tpu.memory_space<vmem>>, vector<8x8xf32>
    %c0_1 = arith.constant 0 : index
    %c0_2 = arith.constant 0 : index
    %1 = vector.load %arg2[%c0_1, %c0_2] : memref<8x64xf32, #tpu.memory_space<vmem>>, vector<8x64xf32>
    %cst = arith.constant dense<0.000000e+00> : vector<8x64xf32>
    %2 = tpu.matmul %0, %1, %cst {dimension_numbers = #tpu.dot_dimension_numbers<[1], [0], [0], [1], [0, 0, 1, 1], [], []>} : vector<8x8xf32>, vector<8x64xf32>, vector<8x64xf32> -> vector<8x64xf32>
    %c0_3 = arith.constant 0 : index
    %c0_4 = arith.constant 0 : index
    %3 = vector.load %arg3[%c0_3, %c0_4] : memref<1x64xf32, #tpu.memory_space<vmem>>, vector<1x64xf32>
    %4 = vector.broadcast %3 : vector<1x64xf32> to vector<8x64xf32>
    %5 = arith.addf %2, %4 : vector<8x64xf32>
    %cst_5 = arith.constant 0.000000e+00 : f32
    %6 = vector.broadcast %cst_5 : f32 to vector<8x64xf32>
    %7 = arith.maximumf %5, %6 : vector<8x64xf32>
    %c0_6 = arith.constant 0 : index
    %c0_7 = arith.constant 0 : index
    %8 = vector.load %arg4[%c0_6, %c0_7] : memref<64x64xf32, #tpu.memory_space<vmem>>, vector<64x64xf32>
    %cst_8 = arith.constant dense<0.000000e+00> : vector<8x64xf32>
    %9 = tpu.matmul %7, %8, %cst_8 {dimension_numbers = #tpu.dot_dimension_numbers<[1], [0], [0], [1], [0, 0, 1, 1], [], []>} : vector<8x64xf32>, vector<64x64xf32>, vector<8x64xf32> -> vector<8x64xf32>
    %c0_9 = arith.constant 0 : index
    %c0_10 = arith.constant 0 : index
    %10 = vector.load %arg5[%c0_9, %c0_10] : memref<1x64xf32, #tpu.memory_space<vmem>>, vector<1x64xf32>
    %11 = vector.broadcast %10 : vector<1x64xf32> to vector<8x64xf32>
    %12 = arith.addf %9, %11 : vector<8x64xf32>
    %cst_11 = arith.constant 0.000000e+00 : f32
    %13 = vector.broadcast %cst_11 : f32 to vector<8x64xf32>
    %14 = arith.maximumf %12, %13 : vector<8x64xf32>
    %c0_12 = arith.constant 0 : index
    %c0_13 = arith.constant 0 : index
    %15 = vector.load %arg6[%c0_12, %c0_13] : memref<64x8xf32, #tpu.memory_space<vmem>>, vector<64x8xf32>
    %cst_14 = arith.constant dense<0.000000e+00> : vector<8x8xf32>
    %16 = tpu.matmul %14, %15, %cst_14 {dimension_numbers = #tpu.dot_dimension_numbers<[1], [0], [0], [1], [0, 0, 1, 1], [], []>} : vector<8x64xf32>, vector<64x8xf32>, vector<8x8xf32> -> vector<8x8xf32>
    %c0_15 = arith.constant 0 : index
    %c0_16 = arith.constant 0 : index
    %17 = vector.load %arg7[%c0_15, %c0_16] : memref<1x8xf32, #tpu.memory_space<vmem>>, vector<1x8xf32>
    %18 = vector.broadcast %17 : vector<1x8xf32> to vector<8x8xf32>
    %19 = arith.addf %16, %18 : vector<8x8xf32>
    %20 = tpu.iota {dimensions = array<i32: 1>} : vector<8x8xi32>
    %cst_17 = arith.constant -5.000000e+00 : f32
    %cst_18 = arith.constant 2.000000e+00 : f32
    %21 = vector.broadcast %cst_17 : f32 to vector<8x8xf32>
    %22 = arith.maximumf %21, %19 : vector<8x8xf32>
    %23 = vector.broadcast %cst_18 : f32 to vector<8x8xf32>
    %24 = arith.minimumf %23, %22 : vector<8x8xf32>
    %25 = math.exp %24 : vector<8x8xf32>
    %c4_i32 = arith.constant 4 : i32
    %26 = vector.broadcast %c4_i32 : i32 to vector<8x8xi32>
    %27 = arith.cmpi sge, %20, %26 : vector<8x8xi32>
    %28 = arith.select %27, %25, %19 : vector<8x8xi1>, vector<8x8xf32>
    %c0_19 = arith.constant 0 : index
    %c0_20 = arith.constant 0 : index
    %29 = vector.load %arg8[%c0_19, %c0_20] : memref<8x8xf32, #tpu.memory_space<vmem>>, vector<8x8xf32>
    tpu.vector_store %arg8[%c0_19, %c0_20], %28 {strides = array<i32>} : memref<8x8xf32, #tpu.memory_space<vmem>>, vector<8x8xf32>,
    return
  }
  func.func @transform_0(%arg0: i32) -> (i32, i32) {
    %c0_i32 = arith.constant 0 : i32
    %c0_i32_0 = arith.constant 0 : i32
    return %arg0, %c0_i32 : i32, i32
  }
  func.func @transform_1(%arg0: i32) -> (i32, i32) {
    %c0_i32 = arith.constant 0 : i32
    %c0_i32_0 = arith.constant 0 : i32
    %c0_i32_1 = arith.constant 0 : i32
    return %c0_i32, %c0_i32_0 : i32, i32
  }
  func.func @transform_2(%arg0: i32) -> (i32, i32) {
    %c0_i32 = arith.constant 0 : i32
    %c0_i32_0 = arith.constant 0 : i32
    %c0_i32_1 = arith.constant 0 : i32
    return %c0_i32, %c0_i32_0 : i32, i32
  }
  func.func @transform_3(%arg0: i32) -> (i32, i32) {
    %c0_i32 = arith.constant 0 : i32
    %c0_i32_0 = arith.constant 0 : i32
    %c0_i32_1 = arith.constant 0 : i32
    return %c0_i32, %c0_i32_0 : i32, i32
  }
  func.func @transform_4(%arg0: i32) -> (i32, i32) {
    %c0_i32 = arith.constant 0 : i32
    %c0_i32_0 = arith.constant 0 : i32
    %c0_i32_1 = arith.constant 0 : i32
    return %c0_i32, %c0_i32_0 : i32, i32
  }
  func.func @transform_5(%arg0: i32) -> (i32, i32) {
    %c0_i32 = arith.constant 0 : i32
    %c0_i32_0 = arith.constant 0 : i32
    %c0_i32_1 = arith.constant 0 : i32
    return %c0_i32, %c0_i32_0 : i32, i32
  }
  func.func @transform_6(%arg0: i32) -> (i32, i32) {
    %c0_i32 = arith.constant 0 : i32
    %c0_i32_0 = arith.constant 0 : i32
    %c0_i32_1 = arith.constant 0 : i32
    return %c0_i32, %c0_i32_0 : i32, i32
  }
  func.func @transform_7(%arg0: i32) -> (i32, i32) {
    %c0_i32 = arith.constant 0 : i32
    %c0_i32_0 = arith.constant 0 : i32
    return %arg0, %c0_i32 : i32, i32
  }
}

</mosaic_0001>

<bundles_post_ra>
// kernel: actor_forward.1
= control target key start
LH: loop header
LB: loop body
LE: loop exit
PB: predicated region body
PF: predicated region fallthrough
CT: control target
= control target key end

     0   :  { %12 = vsyncpa [#allocation3], 0  ;;  %s563_s0 = inlined_call_operand.vmem [shape: f32[8,8], index: 0, kind: input, shape index: {}]   ;;  %s564_s1 = inlined_call_operand.hbm [shape: f32[8,64], index: 1, kind: input, shape index: {}]   ;;  %s565_s2 = inlined_call_operand.vmem [shape: f32[1,64], index: 2, kind: input, shape index: {}]   ;;  %s566_s3 = inlined_call_operand.vmem [shape: f32[64,64], index: 3, kind: input, shape index: {}]   ;;  %s567_s4 = inlined_call_operand.hbm [shape: f32[1,64], index: 4, kind: input, shape index: {}]   ;;  %s568_s5 = inlined_call_operand.vmem [shape: f32[64,8], index: 5, kind: input, shape index: {}]   ;;  %s569_s6 = inlined_call_operand.vmem [shape: f32[1,8], index: 6, kind: input, shape index: {}]   ;;  %s570_s7 = inlined_call_operand.vmem [shape: f32[8,8], index: 7, kind: output, shape index: {}]  }
   0x1   :  { %13 = vsyncpa [#allocation5], 0  ;;  %s446_s24 = smov [#allocation2]   ;;  %s447_s26 = smov [#allocation4]  }
   0x2   :  { %s22_s25 = sshll.u32 %s446_s24, 4  ;;  %s36_s27 = sshll.u32 %s447_s26, 4  ;;  %s23_s25 = int_to_ptr.vmem [resolvable:$true] %s22_s25  ;;  %s37_s27 = int_to_ptr.vmem [resolvable:$true] %s36_s27 }
   0x3   :  { %s410_s28 = scalar_lea.vmem %s23_s25, 128  ;;  %p415_p1 = scmp.lt.s32.totalorder %s23_s25, %s23_s25 }
   0x4   :  { %p411_p0 = scmp.ne.s32.totalorder %s23_s25, %s410_s28  ;;  %p416_p2 = scmp.lt.s32.totalorder %s410_s28, %s410_s28 }
   0x6   :  { %p417_p3 = por %p416_p2, %p415_p1 }
   0x8   :  { %p418_p4 = pnand %p417_p3, %p411_p0 }
   0xa   :  { %421 = shalt.err (!%p418_p4)
}
   0xb   :  { %25 = dma.hbm_to_vmem [thread:$0]  %s564_s1, 128, %s23_s25, [#allocation3]  }
   0xc   :  { %s430_s8 = scalar_lea.vmem %s37_s27, 16  ;;  %s434_s9 = scalar_lea.vmem %s37_s27, 32 }
   0xd   :  { %p431_p5 = scmp.ne.s32.totalorder %s37_s27, %s430_s8  ;;  %p435_p6 = scmp.lt.s32.totalorder %s37_s27, %s37_s27 }
   0xe   :  { %p436_p7 = scmp.lt.s32.totalorder %s434_s9, %s430_s8 }
  0x10   :  { %p437_p8 = por %p436_p7, %p435_p6 }
  0x12   :  { %p438_p9 = pnand %p437_p8, %p431_p5 }
  0x14   :  { %441 = shalt.err (!%p438_p9)
}
  0x15   :  { %39 = dma.hbm_to_vmem [thread:$0]  %s567_s4, 16, %s37_s27, [#allocation5]  }
  0x16   :  { %442 = dma.done.wait [#allocation3], 128  }
  0x17   :  { %443 = vsyncadd [#allocation3], 4294967168 }
  0x18   :  { %444 = dma.done.wait [#allocation5], 16  }
  0x19   :  { %445 = vsyncadd [#allocation5], 4294967280  ;;  %v448_v0 = vmov 0.0   ;;  %vm449_vm0 = vmmov 0   ;;  %vm59_vm1 = vcmask 64512   ;;  %v51_v1 = vld [vmem:[#allocation2] sm:$0xff]  ;;  %v312_v36 = vlaneseq }
  0x1a   :  { %353 = vmatprep.subr.mxu0 %v448_v0  ;;  %355 = vmatprep.mubr.msk.f32.mxu0 %vm449_vm0, %v448_v0  ;;  %v50_v2 = vld [vmem:[%s563_s0] sm:$0xff]  ;;  %v141_v3 = vld [vmem:[%s566_s3 + $0x38] sm:$0xff]  ;;  %v140_v4 = vld [vmem:[%s566_s3 + $0x30] sm:$0xff]  ;;  %vm149_vm2 = vcmask 523264  }
  0x1b   :  { %358 = vmatprep.subr.mxu1 %v448_v0  ;;  %374 = vmatprep.mubr.msk.f32.mxu1 %vm449_vm0, %v448_v0  ;;  %v139_v5 = vld [vmem:[%s566_s3 + $0x28] sm:$0xff]  ;;  %v138_v6 = vld [vmem:[%s566_s3 + $0x20] sm:$0xff]  ;;  %v137_v7 = vld [vmem:[%s566_s3 + $0x18] sm:$0xff]  ;;  %v313_v37 = vand.u32 127, %v312_v36 }
  0x1c   :  { %354 = vmatpush3.msra.mxu0 %v51_v1  ;;  %359 = vmatpush3.msra.mxu1 %v141_v3  ;;  %v136_v8 = vld [vmem:[%s566_s3 + $0x10] sm:$0xff]  ;;  %v135_v9 = vld [vmem:[%s566_s3 + $0x8] sm:$0xff]  ;;  %v134_v10 = vld [vmem:[%s566_s3] sm:$0xff] }
  0x1d   :  { %356 = vmatmul.mubr.msk.f32.vlgmr.msra.gmra.mxu0 %vm59_vm1, %v50_v2  ;;  %360 = vmatprep.subr.mxu1 %v448_v0  ;;  %v231_v11 = vld [vmem:[%s568_s5 + $0x38] sm:$0xff]  ;;  %v230_v12 = vld [vmem:[%s568_s5 + $0x30] sm:$0xff]  ;;  %v229_v13 = vld [vmem:[%s568_s5 + $0x28] sm:$0xff]  ;;  %vm318_vm3 = vcmp.ge.s32.totalorder %v313_v37, 4 }
  0x1e   :  { %361 = vmatpush3.msra.mxu1 %v140_v4  ;;  %377 = vmatprep.subr.mxu0 %v448_v0  ;;  %v228_v14 = vld [vmem:[%s568_s5 + $0x20] sm:$0xff]  ;;  %v227_v15 = vld [vmem:[%s568_s5 + $0x18] sm:$0xff]  ;;  %v226_v21 = vld [vmem:[%s568_s5 + $0x10] sm:$0xff] }
  0x1f   :  { %362 = vmatprep.subr.mxu1 %v448_v0  ;;  %393 = vmatprep.mubr.msk.f32.mxu0 %vm449_vm0, %v448_v0  ;;  %v327_v16 = vld [vmem:[%s565_s2] ss:$0 sm:$0xff]  ;;  %v225_v22 = vld [vmem:[%s568_s5 + $0x8] sm:$0xff] }
  0x20   :  { %363 = vmatpush3.msra.mxu1 %v139_v5  ;;  %378 = vmatpush3.msra.mxu0 %v231_v11  ;;  %v224_v23 = vld [vmem:[%s568_s5] sm:$0xff]  ;;  %v329_v24 = vld [vmem:[#allocation4] ss:$0 sm:$0xff] }
  0x21   :  { %364 = vmatprep.subr.mxu1 %v448_v0  ;;  %379 = vmatprep.subr.mxu0 %v448_v0  ;;  %v331_v29 = vld [vmem:[%s569_s6] ss:$0 sm:$0xff] }
  0x22   :  { %365 = vmatpush3.msra.mxu1 %v138_v6  ;;  %380 = vmatpush3.msra.mxu0 %v230_v12 }
  0x23   :  { %366 = vmatprep.subr.mxu1 %v448_v0  ;;  %381 = vmatprep.subr.mxu0 %v448_v0 }
  0x24   :  { %367 = vmatpush3.msra.mxu1 %v137_v7  ;;  %382 = vmatpush3.msra.mxu0 %v229_v13 }
  0x25   :  { %368 = vmatprep.subr.mxu1 %v448_v0  ;;  %383 = vmatprep.subr.mxu0 %v448_v0 }
  0x26   :  { %369 = vmatpush3.msra.mxu1 %v136_v8  ;;  %384 = vmatpush3.msra.mxu0 %v228_v14 }
  0x27   :  { %370 = vmatprep.subr.mxu1 %v448_v0  ;;  %385 = vmatprep.subr.mxu0 %v448_v0 }
  0x28   :  { %371 = vmatpush3.msra.mxu1 %v135_v9  ;;  %386 = vmatpush3.msra.mxu0 %v227_v15 }
  0x29   :  { %372 = vmatprep.subr.mxu1 %v448_v0  ;;  %387 = vmatprep.subr.mxu0 %v448_v0 }
  0x2a   :  { %373 = vmatpush3.msra.mxu1 %v134_v10  ;;  %388 = vmatpush3.msra.mxu0 %v226_v21 }
  0x2b   :  { %389 = vmatprep.subr.mxu0 %v448_v0 }
  0x2c   :  { %390 = vmatpush3.msra.mxu0 %v225_v22 }
  0x2d   :  { %391 = vmatprep.subr.mxu0 %v448_v0 }
  0x2e   :  { %392 = vmatpush3.msra.mxu0 %v224_v23 }
  0xdd   :  { %v129_v17 = vpop.f32.mrf.mxu0 }
  0xde   :  { %v130_v18 = vadd.f32 %v327_v16, %v129_v17 }
  0xdf   :  { %v357_v19 = vpop.f32.mrf.mxu0 }
  0xe0   :  { %v133_v20 = vmax.f32 %v130_v18, 0.0 }
  0xe2   :  { %375 = vmatmul.mubr.msk.f32.vlgmr.msra.gmra.mxu1 %vm149_vm2, %v133_v20 }
 0x1a2   :  { %v219_v25 = vpop.f32.mrf.mxu1 }
 0x1a3   :  { %v220_v26 = vadd.f32 %v329_v24, %v219_v25 }
 0x1a4   :  { %v376_v27 = vpop.f32.mrf.mxu1 }
 0x1a5   :  { %v223_v28 = vmax.f32 %v220_v26, 0.0 }
 0x1a7   :  { %394 = vmatmul.mubr.msk.f32.vlgmr.msra.gmra.mxu0 %vm149_vm2, %v223_v28 }
 0x267   :  { %v308_v30 = vpop.f32.mrf.mxu0 }
 0x268   :  { %v309_v31 = vadd.f32 %v331_v29, %v308_v30 }
 0x269   :  { %v395_v32 = vpop.f32.mrf.mxu0 }
 0x26a   :  { %v314_v33 = vmax.f32 %v309_v31, -5.0 }
 0x26c   :  { %v315_v34 = vmin.f32 %v314_v33, 2.0 }
 0x26e   :  { %v316_v35 = vmul.f32 1.442695, %v315_v34 }
 0x270   :  { %400 = vpow2.f32 %v316_v35 }
 0x27d   :  { %v401_v38 = vpop.eup %400 }
 0x27e   :  { %v319_v39 = vsel %vm318_vm3, %v401_v38, %v309_v31 }
 0x27f   :  { %320 = vst.msk [vmem:[%s570_s7] sm:$0xff] %vm59_vm1, %v319_v39 }
 0x280   :  { %325 = vsyncpa [#allocation3], 1 }
 0x281   :  { %326 = vsyncpa [#allocation5], 1 }

</bundles_post_ra>
